<compile_context>
chip_gen: v6e
topology: v6e:2x2x1
jax: 0.10.0
libtpu: 0.0.40
codegen_flags: <defaults>
</compile_context>

<pallas_src>
import jax
import jax.numpy as jnp
from jax.experimental import pallas as pl
from jax.experimental.pallas import tpu as pltpu


# ----------------------------------------------------------------------------
# Fused 1x1 conv (+ bias) kernel: one lane-dense MXU matmul per grid step.
# ----------------------------------------------------------------------------
def _conv1x1_kernel(x_ref, w_ref, b_ref, o_ref):
    # x_ref: (Cin, tile_l)   w_ref: (Cout, Cin)   b_ref: (Cout, 1)
    # o_ref: (Cout, tile_l)
    acc = jnp.dot(w_ref[...], x_ref[...],
                  preferred_element_type=jnp.float32)        # (Cout, tile_l) f32
    o_ref[...] = (acc + b_ref[...]).astype(o_ref.dtype)


def _pick_tile(L, c_in, c_out, itemsize, vmem_budget_bytes, tile_max=8192):
    """Largest lane-tile (multiple of 128) fitting the VMEM budget, keeping
    the grid >= 2 steps whenever the problem allows (for v7x's 2 TCs)."""
    # double-buffered input + output blocks, per lane column
    per_lane = 2 * (c_in + c_out) * itemsize
    by_vmem = max(128, (vmem_budget_bytes // per_lane) // 128 * 128)
    tile = min(tile_max, by_vmem)
    if L <= tile:
        if L >= 256:
            tile = max(128, (L // 2) // 128 * 128)   # >= 2 grid steps
        else:
            tile = 128
    return int(tile)


def conv1x1(x_nchw, w, b, *, tile_l=None, vmem_budget_bytes=16 << 20):
    """x_nchw: (N, Cin, H, W); w: (Cout, Cin); b: (Cout,) -> (N, Cout, H, W)."""
    N, c_in, H, W = x_nchw.shape
    c_out = w.shape[0]
    L = N * H * W
    itemsize = jnp.dtype(x_nchw.dtype).itemsize

    # Fold batch into the lane axis: (Cin, N*H*W).  One-pass XLA transpose.
    x = jnp.transpose(x_nchw, (1, 0, 2, 3)).reshape(c_in, L)

    if tile_l is None:
        tile_l = _pick_tile(L, c_in, c_out, itemsize, vmem_budget_bytes)

    num_tiles = pl.cdiv(L, tile_l)
    Lp = num_tiles * tile_l
    if Lp != L:
        # Pad lane axis up to a tile multiple (zero columns, sliced off below).
        x = jnp.pad(x, ((0, 0), (0, Lp - L)))

    b2 = b.reshape(c_out, 1)

    # Advisory cost estimate for XLA scheduling around the custom call.
    bytes_accessed = (c_in * Lp + c_out * Lp + c_out * c_in + c_out) * itemsize
    cost = pl.CostEstimate(flops=2 * c_in * c_out * Lp,
                           transcendentals=0,
                           bytes_accessed=bytes_accessed)

    # Explicit VMEM budget: double-buffered in/out blocks + f32 acc + weights.
    needed = (2 * (c_in + c_out) * tile_l * itemsize        # pipelined blocks
              + c_out * tile_l * 4                          # f32 accumulator
              + (c_out * c_in + c_out) * itemsize)          # resident w, b
    vmem_limit = int(min(max(4 * needed, 8 << 20), 24 << 20))

    y = pl.pallas_call(
        _conv1x1_kernel,
        out_shape=jax.ShapeDtypeStruct((c_out, Lp), x_nchw.dtype),
        grid=(num_tiles,),
        in_specs=[
            pl.BlockSpec((c_in, tile_l), lambda t: (0, t)),   # activations
            pl.BlockSpec((c_out, c_in), lambda t: (0, 0)),    # weights (resident)
            pl.BlockSpec((c_out, 1), lambda t: (0, 0)),       # bias (resident)
        ],
        out_specs=pl.BlockSpec((c_out, tile_l), lambda t: (0, t)),
        compiler_params=pltpu.CompilerParams(
            dimension_semantics=("parallel",),   # shards lane tiles across TCs
            vmem_limit_bytes=vmem_limit),
        cost_estimate=cost,
    )(x, w, b2)

    y = y[:, :L].reshape(c_out, N, H, W)
    return jnp.transpose(y, (1, 0, 2, 3))


# ----------------------------------------------------------------------------
# Deterministic synthetic parameters (no checkpoint loading).
# PyTorch Conv2d(in_ch, out_ch, 1) weight (out_ch, in_ch, 1, 1) -> (out_ch, in_ch).
# ----------------------------------------------------------------------------
def make_outconv_params(key, c_in, c_out):
    kw, kb = jax.random.split(key, 2)
    w = jax.random.normal(kw, (c_out, c_in), jnp.float32) * 0.1
    b = jax.random.normal(kb, (c_out,), jnp.float32) * 0.1
    return w, b


def outconv_forward(x_nchw, w, b):
    return conv1x1(x_nchw, w, b)


if __name__ == "__main__":
    N, in_ch, H, W = 2, 4, 16, 16
    out_ch = 8

    key = jax.random.PRNGKey(0)
    kx, kp = jax.random.split(key, 2)

    x = jax.random.normal(kx, (N, in_ch, H, W), jnp.float32)
    w, b = make_outconv_params(kp, in_ch, out_ch)

    y = outconv_forward(x, w, b)
    jax.block_until_ready(y)

    assert y.shape == (N, out_ch, H, W)

    # Light correctness check against a pure-JAX reference.
    y_ref = jnp.einsum("oc,nchw->nohw", w, x) + b.reshape(1, out_ch, 1, 1)
    assert jnp.allclose(y, y_ref, rtol=1e-3, atol=1e-3)

    print("KERNEL_OK")
</pallas_src>

<mosaic_0001>
module attributes {stable_mosaic.version = 11 : i64} {
  func.func @_conv1x1_kernel(%arg0: i32, %arg1: memref<4x256xf32, #tpu.memory_space<vmem>>, %arg2: memref<8x4xf32, #tpu.memory_space<vmem>>, %arg3: memref<8x1xf32, #tpu.memory_space<vmem>>, %arg4: memref<8x256xf32, #tpu.memory_space<vmem>>) attributes {dimension_semantics = [#tpu.dimension_semantics<parallel>], iteration_bounds = array<i64: 2>, scalar_prefetch = 0 : i64, scratch_operands = 0 : i64, tpu.core_type = #tpu.core_type<tc>, window_params = [{transform_indices = @transform_0, window_bounds = array<i64: 4, 256>}, {pipeline_mode = #tpu.pipeline_mode<synchronous>, transform_indices = @transform_1, window_bounds = array<i64: 8, 4>}, {pipeline_mode = #tpu.pipeline_mode<synchronous>, transform_indices = @transform_2, window_bounds = array<i64: 8, 1>}, {transform_indices = @transform_3, window_bounds = array<i64: 8, 256>}]} {
    %c0 = arith.constant 0 : index
    %c0_0 = arith.constant 0 : index
    %0 = vector.load %arg2[%c0, %c0_0] : memref<8x4xf32, #tpu.memory_space<vmem>>, vector<8x4xf32>
    %c0_1 = arith.constant 0 : index
    %c0_2 = arith.constant 0 : index
    %1 = vector.load %arg1[%c0_1, %c0_2] : memref<4x256xf32, #tpu.memory_space<vmem>>, vector<4x256xf32>
    %cst = arith.constant dense<0.000000e+00> : vector<8x256xf32>
    %2 = tpu.matmul %0, %1, %cst {dimension_numbers = #tpu.dot_dimension_numbers<[1], [0], [0], [1], [0, 0, 1, 1], [], []>} : vector<8x4xf32>, vector<4x256xf32>, vector<8x256xf32> -> vector<8x256xf32>
    %c0_3 = arith.constant 0 : index
    %c0_4 = arith.constant 0 : index
    %3 = vector.load %arg3[%c0_3, %c0_4] : memref<8x1xf32, #tpu.memory_space<vmem>>, vector<8x1xf32>
    %4 = vector.broadcast %3 : vector<8x1xf32> to vector<8x256xf32>
    %5 = arith.addf %2, %4 : vector<8x256xf32>
    %c0_5 = arith.constant 0 : index
    %c0_6 = arith.constant 0 : index
    %6 = vector.load %arg4[%c0_5, %c0_6] : memref<8x256xf32, #tpu.memory_space<vmem>>, vector<8x256xf32>
    tpu.vector_store %arg4[%c0_5, %c0_6], %5 {strides = array<i32>} : memref<8x256xf32, #tpu.memory_space<vmem>>, vector<8x256xf32>,
    return
  }
  func.func @transform_0(%arg0: i32) -> (i32, i32) {
    %c0_i32 = arith.constant 0 : i32
    %c0_i32_0 = arith.constant 0 : i32
    return %c0_i32, %arg0 : i32, i32
  }
  func.func @transform_1(%arg0: i32) -> (i32, i32) {
    %c0_i32 = arith.constant 0 : i32
    %c0_i32_0 = arith.constant 0 : i32
    %c0_i32_1 = arith.constant 0 : i32
    return %c0_i32, %c0_i32_0 : i32, i32
  }
  func.func @transform_2(%arg0: i32) -> (i32, i32) {
    %c0_i32 = arith.constant 0 : i32
    %c0_i32_0 = arith.constant 0 : i32
    %c0_i32_1 = arith.constant 0 : i32
    return %c0_i32, %c0_i32_0 : i32, i32
  }
  func.func @transform_3(%arg0: i32) -> (i32, i32) {
    %c0_i32 = arith.constant 0 : i32
    %c0_i32_0 = arith.constant 0 : i32
    return %c0_i32, %arg0 : i32, i32
  }
}

</mosaic_0001>

<bundles_post_ra>
// kernel: tpu_custom_call.1
= control target key start
LH: loop header
LB: loop body
LE: loop exit
PB: predicated region body
PF: predicated region fallthrough
CT: control target
= control target key end

     0   :  { %8 = vsyncpa [#allocation3], 0  ;;  %s574_s0 = inlined_call_operand.vmem [shape: f32[4,512], index: 0, kind: input, shape index: {}]   ;;  %s575_s1 = inlined_call_operand.vmem [shape: f32[8,4], index: 1, kind: input, shape index: {}]   ;;  %s576_s2 = inlined_call_operand.vmem [shape: f32[8,1], index: 2, kind: input, shape index: {}]   ;;  %s577_s3 = inlined_call_operand.hbm [shape: f32[8,512], index: 3, kind: output, shape index: {}]  }
   0x1   :  { %10 = vsyncpa [#allocation3 + $0x1], 0  ;;  %s482_s12 = smov 0   ;;  %s484_s13 = smov 0  }
   0x2   :  { %s486_s14 = smov 0   ;;  %s488_s15 = smov 0  }
   0x3 LB: > { %s503_s16 = sadd.s32 4294967295, %s457_s15   ;;  %s338_s17 = sadd.s32 4294967294, %s457_s15   ;;  %s457_s15 = sphi %s488_s15, %s583_s15   ;;  %s453_s14 = sphi %s486_s14, %s582_s14   ;;  %s449_s13 = sphi %s484_s13, %s581_s13   ;;  %s445_s12 = sphi %s482_s12, %s580_s12  }
   0x4   : > { %s507_s18 = sadd.s32 1, %s457_s15   ;;  %s91_s19 = sadd.s32 1, %s453_s14 }
   0x5   : > { %s88_s20 = ssub.s32 %s457_s15, %s507_s18  ;;  %p101_p0 = scmp.ne.s32.totalorder %s453_s14, %s449_s13 }
   0x6   : > { %p89_p1 = scmp.eq.s32.totalorder %s88_s20, 0  ;;  %p102_p2 = scmp.eq.s32.totalorder %s503_s16, 1 }
   0x7   : > { %p107_p3 = scmp.ne.s32.totalorder %s449_s13, %s445_s12  ;;  %p108_p4 = scmp.eq.s32.totalorder %s338_s17, 1 }
   0x8   : > { %s518_s21 = scalar_select %p89_p1, %s453_s14, %s91_s19  }
   0x9   : > { %p520_p5 = por %p102_p2, %p101_p0  ;;  %p524_p6 = por %p108_p4, %p107_p3 }
   0xa   : > { %p341_p7 = scmp.ge.s32.totalorder %s457_s15, 1  ;;  %p141_p8 = scmp.lt.s32.totalorder %s457_s15, 3 }
   0xc   : > { %p142_p9 = pnand %p341_p7, %p141_p8 }
   0xd   : > { %s343_s24 = sshll.u32 (!%p142_p9), %s503_s16, 1  ;;  %s162_s6 = sand.u32 (!%p142_p9), 1, %s449_s13  }
   0xe   : > { %145 = sbr.rel (%p142_p9) target bundleno = 237 (0xed), region = 32  ;;  %p166_p10 = scmp.lt.s32.totalorder (!%p142_p9), %s343_s24, 3 }
   0xf   : > { %s342_s7 = sshll.u32 (!%p142_p9), %s162_s6, 4  ;;  %s353_s8 = sshll.u32 (!%p142_p9), %s503_s16, 8 }
  0x10   : > { %s164_s9 = scalar_lea.vmem (!%p142_p9), [#allocation2], %s342_s7  ;;  %s277_s19 = scalar_lea.hbm (!%p142_p9), %s577_s3, %s353_s8 }
  0x11   : > { %s279_s10 = sshll.u32 (!%p142_p9), %s164_s9, 4  ;;  %s265_s20 = scalar_lea.sflag (!%p142_p9), [#allocation3], %s162_s6  ;;  %s280_s10 = int_to_ptr.vmem [resolvable:$true] %s279_s10 }
  0x12   : > { %s461_s25 = smov (!%p142_p9), [#allocation2]  }
  0x13   : > { %v459_v0 = vmov 0.0   ;;  %v460_v1 = vmov 0   ;;  %v174_v2 = vld [vmem:[%s576_s2] sm:$0xff]  ;;  %s585_s24 = smov (!%p166_p10, %s343_s24), 3  ;;  %vm186_vm0 = vcmask 1043456   ;;  %vm182_vm1 = vcmask 31744  }
  0x14   : > { %255 = vmatprep.mubr.f32.mxu0 %v459_v0  ;;  %395 = vset.pattern.permute.xlu0 %v460_v1  ;;  %s344_s27 = sshll.u32 %s585_s24, 2  ;;  %v172_v5 = vld [vmem:[%s575_s1] sm:$0xff]  ;;  %s397_s24 = scalar_lea.vmem %s280_s10, 256 }
  0x15   : > { %177 = vperm.xlu0 %395, %v174_v2   ;;  %s169_s30 = scalar_lea.vmem %s574_s0, %s344_s27  ;;  %p398_p11 = scmp.ne.s32.totalorder %s280_s10, %s397_s24 }
  0x16   : > { %v173_v3 = vld [vmem:[%s169_s30] sm:$0xff]  ;;  %s401_s16 = sshll.u32 %s461_s25, 4  ;;  %s402_s16 = int_to_ptr.vmem [resolvable:$false] %s401_s16 }
  0x17   : > { %v181_v4 = vcombine.high %v173_v3, %v173_v3  ;;  %p399_p12 = pnand %p398_p11, %p520_p5  ;;  %s403_s26 = scalar_lea.vmem %s402_s16, 512 }
  0x18   : > { %p404_p0 = scmp.lt.s32.totalorder %s280_s10, %s402_s16  ;;  %p405_p1 = scmp.lt.s32.totalorder %s403_s26, %s397_s24 }
  0x19   : > { %345 = vmatprep.subr.msk.mxu0 %vm186_vm0, %v181_v4  ;;  %p400_p13 = pneg %p399_p12 }
  0x1a   : > { %346 = vmatpush1.msk.msra.mxu0 %vm186_vm0, %v173_v3  ;;  %p406_p2 = por %p405_p1, %p404_p0 }
  0x1b   : > { %347 = vmatmul.mubr.msk.f32.vlgmr.msra.gmra.mxu0 %vm182_vm1, %v172_v5 }
  0x1c   : > { %p407_p3 = pnand %p406_p2, %p400_p13 }
  0x90   : > { %v178_v6 = vpop.permute.xlu0 %177 }
  0xdb   : > { %v257_v7 = vpop.f32.mrf.mxu0 }
  0xdc   : > { %v258_v8 = vadd.f32 %v257_v7, %v178_v6 }
  0xdd   : > { %v259_v9 = vpop.f32.mrf.mxu0 }
  0xde   : > { %262 = vst [vmem:[%s164_s9] sm:$0xff] %v258_v8  ;;  %v260_v10 = vadd.f32 %v259_v9, %v178_v6 }
  0xe0   : > { %263 = vst [vmem:[%s164_s9 + $0x8] sm:$0xff] %v260_v10 }
  0xe1   : > { %410 = shalt.err (!%p407_p3)
}
  0xe2   : > { %s411_s27 = scalar_lea.hbm %s277_s19, 256  ;;  %s415_s30 = scalar_lea.hbm %s577_s3, 512 }
  0xe3   : > { %p412_p4 = scmp.ne.s32.totalorder %s277_s19, %s411_s27  ;;  %p416_p9 = scmp.lt.s32.totalorder %s277_s19, %s577_s3 }
  0xe4   : > { %p417_p10 = scmp.lt.s32.totalorder %s415_s30, %s411_s27 }
  0xe5   : > { %p413_p7 = pnand %p412_p4, %p520_p5 }
  0xe6   : > { %p418_p11 = por %p417_p10, %p416_p9 }
  0xe7   : > { %p414_p8 = pneg %p413_p7 }
  0xe9   : > { %p419_p12 = pnand %p418_p11, %p414_p8 }
  0xeb   : > { %422 = shalt.err (!%p419_p12)
}
  0xec   : > { %354 = dma.vmem_to_hbm [thread:$0]  (%p520_p5), %s280_s10, 256, %s277_s19, %s265_s20  }
  0xed PF: > { %p360_p13 = scmp.ge.s32.totalorder %s457_s15, 2  ;;  %s291_s6 = sand.u32 1, %s445_s12  }
  0xee   : > { %s292_s7 = scalar_lea.sflag [#allocation3], %s291_s6 }
  0xef   : > { %p357_p0 = pnand %p360_p13, %p524_p6 }
  0xf1   : > { %p358_p1 = pneg %p357_p0 }
  0xf3   : > { %440 = dma.done.wait (%p358_p1), %s292_s7, 256  }
  0xf4   : > { %442 = vsyncadd (%p358_p1), %s292_s7, 4294967040  ;;  %p13_p2 = scmp.ge.s32.totalorder %s507_s18, 4   ;;  %s580_s12 = smov %s449_s13 }
  0xf5   : > { %s581_s13 = smov %s453_s14  ;;  %s582_s14 = smov %s518_s21 }
  0xf6   : > { %s583_s15 = smov %s507_s18  ;;  %15 = sbr.rel (!%p13_p2) target bundleno = 3 (0x3), region = 67 }
  0xfb   :  { %297 = vsyncpa [#allocation3], 1 }
  0xfc   :  { %299 = vsyncpa [#allocation3 + $0x1], 1 }

</bundles_post_ra>
